<compile_context>
chip_gen: v6e
topology: v6e:2x2x1
jax: 0.10.0
libtpu: 0.0.40
codegen_flags: <defaults>
</compile_context>

<pallas_src>
import functools

import jax
import jax.numpy as jnp
from jax.experimental import pallas as pl
from jax.experimental.pallas import tpu as pltpu


def _contrastive_loss_kernel(anchor_ref, pos_ref, neg_ref, out_ref,
                             *, inv_temp, b_actual, block_b, needs_mask):
    eps = 1e-8  # matches torch F.cosine_similarity default eps

    a = anchor_ref[...].astype(jnp.float32)   # (TB, D)
    p = pos_ref[...].astype(jnp.float32)      # (TB, D)
    n = neg_ref[...].astype(jnp.float32)      # (TB, K, D)

    # --- anchor <-> positive cosine similarity (VPU + one EUP rsqrt) --------
    a_sq = jnp.sum(a * a, axis=-1, keepdims=True)            # (TB, 1)
    p_sq = jnp.sum(p * p, axis=-1, keepdims=True)            # (TB, 1)
    dot_ap = jnp.sum(a * p, axis=-1, keepdims=True)          # (TB, 1)
    scale_pos = jax.lax.rsqrt(jnp.maximum(a_sq * p_sq, eps * eps)) * inv_temp
    sim_pos = dot_ap * scale_pos                              # (TB, 1)

    # --- anchor <-> negatives: broadcast-multiply + lane reduce (VPU/XLU) ---
    # (HBM-bound kernel: this hides under the z_neg DMA; avoids an M=1
    #  per-row MXU matmul chain that can become critical on v7x.)
    dot_an = jnp.sum(a[:, None, :] * n, axis=-1)              # (TB, K)
    n_sq = jnp.sum(n * n, axis=-1)                            # (TB, K)
    scale_neg = jax.lax.rsqrt(jnp.maximum(a_sq * n_sq, eps * eps)) * inv_temp
    sim_neg = dot_an * scale_neg                              # (TB, K)

    # --- cross entropy with label 0: separated logsumexp (no concat/slice) --
    m = jnp.maximum(sim_pos, jnp.max(sim_neg, axis=-1, keepdims=True))  # (TB,1)
    sum_exp = jnp.exp(sim_pos - m) + jnp.sum(jnp.exp(sim_neg - m),
                                             axis=-1, keepdims=True)    # (TB,1)
    per_example = (m + jnp.log(sum_exp)) - sim_pos                      # (TB,1)

    if needs_mask:
        # Only the last block can contain out-of-bounds (unspecified) rows;
        # gate the iota+where so the hot-loop body stays minimal.
        i = pl.program_id(0)
        is_last = i == pl.num_programs(0) - 1

        @pl.when(is_last)
        def _masked_store():
            rows = i * block_b + jax.lax.broadcasted_iota(
                jnp.int32, per_example.shape, 0)
            masked = jnp.where(rows < b_actual, per_example, 0.0)
            out_ref[...] = jnp.sum(masked, axis=0, keepdims=True).reshape(1, 1, 1)

        @pl.when(jnp.logical_not(is_last))
        def _plain_store():
            out_ref[...] = jnp.sum(per_example, axis=0,
                                   keepdims=True).reshape(1, 1, 1)
    else:
        out_ref[...] = jnp.sum(per_example, axis=0, keepdims=True).reshape(1, 1, 1)


def _pick_block_b(b, k, d, in_itemsize, vmem_cap_bytes):
    """Largest batch tile (rows) whose double-buffered DMA + f32 compute
    temps fit comfortably in scoped VMEM, clamped to [8, 512]."""
    # Per batch-row VMEM bytes:
    #   double-buffered input blocks (anchor + pos + neg) at HBM dtype,
    #   plus f32 compute copies (incl. one (K,D) broadcast temp).
    per_row = 2 * (2 * d + k * d) * in_itemsize + (2 * d + 2 * k * d) * 4
    budget = vmem_cap_bytes // 2          # leave half for compiler scratch etc.
    tb = budget // max(per_row, 1)
    tb = max(8, min(int(tb), 512))
    if tb >= b:
        return b                          # whole batch in one block (always legal)
    tb = max(8, (tb // 8) * 8)            # sublane multiple when tiling the batch
    return min(tb, b)


def contrastive_loss(z_anchor, z_pos, z_neg, temperature: float = 0.1,
                     block_b: int | None = None):
    """Pallas TPU implementation of ContrastiveLoss.forward. Returns scalar f32."""
    assert z_anchor.ndim == 2 and z_pos.shape == z_anchor.shape
    assert z_neg.ndim == 3 and z_neg.shape[0] == z_anchor.shape[0]
    assert z_neg.shape[2] == z_anchor.shape[1]

    b, d = z_anchor.shape
    k = z_neg.shape[1]
    in_itemsize = max(jnp.dtype(z_anchor.dtype).itemsize,
                      jnp.dtype(z_neg.dtype).itemsize)

    try:
        vmem_cap = int(pltpu.get_tpu_info().vmem_capacity_bytes)
    except Exception:
        vmem_cap = 64 << 20               # v7x is the most restrictive (64 MiB)

    if block_b is None:
        tb = _pick_block_b(b, k, d, in_itemsize, vmem_cap)
    else:
        tb = min(int(block_b), b)

    num_blocks = pl.cdiv(b, tb)
    needs_mask = (b % tb) != 0            # no host-side pad: mask in-kernel

    # Explicit scoped-VMEM request: double-buffered input blocks + f32 temps
    # + headroom, capped safely below physical capacity.
    in_block_bytes = (2 * tb * d + tb * k * d) * in_itemsize
    compute_bytes = (2 * tb * d + 2 * tb * k * d) * 4
    needed = 2 * in_block_bytes + compute_bytes + (2 << 20)
    vmem_limit = int(min(vmem_cap * 3 // 4, max(needed, 16 << 20)))

    kernel = functools.partial(
        _contrastive_loss_kernel,
        inv_temp=1.0 / float(temperature),
        b_actual=b,
        block_b=tb,
        needs_mask=needs_mask,
    )

    partials = pl.pallas_call(
        kernel,
        out_shape=jax.ShapeDtypeStruct((num_blocks, 1, 1), jnp.float32),
        grid_spec=pltpu.PrefetchScalarGridSpec(
            num_scalar_prefetch=0,
            grid=(num_blocks,),
            in_specs=[
                pl.BlockSpec((tb, d), lambda i: (i, 0)),
                pl.BlockSpec((tb, d), lambda i: (i, 0)),
                pl.BlockSpec((tb, k, d), lambda i: (i, 0, 0)),
            ],
            out_specs=pl.BlockSpec((1, 1, 1), lambda i: (i, 0, 0)),
        ),
        # Every block writes its own partial sum -> the grid axis is fully
        # independent; "parallel" lets v7x shard blocks across its 2 TCs.
        compiler_params=pltpu.CompilerParams(
            dimension_semantics=("parallel",),
            vmem_limit_bytes=vmem_limit),
    )(z_anchor, z_pos, z_neg)

    return jnp.sum(partials) * (1.0 / b)


def _reference_loss(z_anchor, z_pos, z_neg, temperature=0.1):
    """Pure-JAX reference mirroring the PyTorch forward."""
    eps = 1e-8
    a = z_anchor.astype(jnp.float32)
    p = z_pos.astype(jnp.float32)
    n = z_neg.astype(jnp.float32)
    an = jnp.linalg.norm(a, axis=-1)
    pn = jnp.linalg.norm(p, axis=-1)
    nn_ = jnp.linalg.norm(n, axis=-1)
    sim_pos = jnp.sum(a * p, -1) / jnp.maximum(an * pn, eps) / temperature
    sim_neg = jnp.sum(a[:, None, :] * n, -1) / jnp.maximum(an[:, None] * nn_, eps) / temperature
    logits = jnp.concatenate([sim_pos[:, None], sim_neg], axis=1)
    lse = jax.scipy.special.logsumexp(logits, axis=-1)
    return jnp.mean(lse - logits[:, 0])


if __name__ == "__main__":
    B, K, D = 2, 8, 32
    key = jax.random.PRNGKey(0)
    k1, k2, k3 = jax.random.split(key, 3)
    z_anchor = jax.random.normal(k1, (B, D), dtype=jnp.float32)
    z_pos = jax.random.normal(k2, (B, D), dtype=jnp.float32)
    z_neg = jax.random.normal(k3, (B, K, D), dtype=jnp.float32)

    loss = contrastive_loss(z_anchor, z_pos, z_neg, temperature=0.1)
    loss = jax.block_until_ready(loss)

    ref = _reference_loss(z_anchor, z_pos, z_neg, temperature=0.1)
    # Exact rsqrt (no approx reciprocal) -> tight agreement with the reference.
    assert jnp.allclose(loss, ref, atol=1e-4, rtol=1e-4), (loss, ref)

    print("KERNEL_OK")
</pallas_src>

<mosaic_0001>
module attributes {stable_mosaic.version = 11 : i64} {
  func.func @_contrastive_loss_kernel(%arg0: i32, %arg1: memref<2x32xf32, #tpu.memory_space<vmem>>, %arg2: memref<2x32xf32, #tpu.memory_space<vmem>>, %arg3: memref<2x8x32xf32, #tpu.memory_space<vmem>>, %arg4: memref<1x1x1xf32, #tpu.memory_space<vmem>>) attributes {dimension_semantics = [#tpu.dimension_semantics<parallel>], iteration_bounds = array<i64: 1>, scalar_prefetch = 0 : i64, scratch_operands = 0 : i64, tpu.core_type = #tpu.core_type<tc>, window_params = [{transform_indices = @transform_0, window_bounds = array<i64: 2, 32>}, {transform_indices = @transform_1, window_bounds = array<i64: 2, 32>}, {transform_indices = @transform_2, window_bounds = array<i64: 2, 8, 32>}, {transform_indices = @transform_3, window_bounds = array<i64: 1, 1, 1>}]} {
    %c0 = arith.constant 0 : index
    %c0_0 = arith.constant 0 : index
    %0 = vector.load %arg1[%c0, %c0_0] : memref<2x32xf32, #tpu.memory_space<vmem>>, vector<2x32xf32>
    %c0_1 = arith.constant 0 : index
    %c0_2 = arith.constant 0 : index
    %1 = vector.load %arg2[%c0_1, %c0_2] : memref<2x32xf32, #tpu.memory_space<vmem>>, vector<2x32xf32>
    %c0_3 = arith.constant 0 : index
    %c0_4 = arith.constant 0 : index
    %c0_5 = arith.constant 0 : index
    %2 = vector.load %arg3[%c0_3, %c0_4, %c0_5] : memref<2x8x32xf32, #tpu.memory_space<vmem>>, vector<2x8x32xf32>
    %3 = arith.mulf %0, %0 : vector<2x32xf32>
    %cst = arith.constant dense<0.000000e+00> : vector<2xf32>
    %4 = vector.multi_reduction <add>, %3, %cst [1] : vector<2x32xf32> to vector<2xf32>
    %5 = vector.shape_cast %4 : vector<2xf32> to vector<2x1xf32>
    %6 = arith.mulf %1, %1 : vector<2x32xf32>
    %cst_6 = arith.constant dense<0.000000e+00> : vector<2xf32>
    %7 = vector.multi_reduction <add>, %6, %cst_6 [1] : vector<2x32xf32> to vector<2xf32>
    %8 = vector.shape_cast %7 : vector<2xf32> to vector<2x1xf32>
    %9 = arith.mulf %0, %1 : vector<2x32xf32>
    %cst_7 = arith.constant dense<0.000000e+00> : vector<2xf32>
    %10 = vector.multi_reduction <add>, %9, %cst_7 [1] : vector<2x32xf32> to vector<2xf32>
    %11 = vector.shape_cast %10 : vector<2xf32> to vector<2x1xf32>
    %12 = arith.mulf %5, %8 : vector<2x1xf32>
    %cst_8 = arith.constant 1.000000e-16 : f32
    %13 = vector.broadcast %cst_8 : f32 to vector<2x1xf32>
    %14 = arith.maximumf %12, %13 : vector<2x1xf32>
    %15 = math.rsqrt %14 : vector<2x1xf32>
    %cst_9 = arith.constant 1.000000e+01 : f32
    %16 = vector.broadcast %cst_9 : f32 to vector<2x1xf32>
    %17 = arith.mulf %15, %16 : vector<2x1xf32>
    %18 = arith.mulf %11, %17 : vector<2x1xf32>
    %19 = vector.shape_cast %0 : vector<2x32xf32> to vector<2x1x32xf32>
    %20 = vector.broadcast %19 : vector<2x1x32xf32> to vector<2x8x32xf32>
    %21 = arith.mulf %20, %2 : vector<2x8x32xf32>
    %cst_10 = arith.constant dense<0.000000e+00> : vector<2x8xf32>
    %22 = vector.multi_reduction <add>, %21, %cst_10 [2] : vector<2x8x32xf32> to vector<2x8xf32>
    %23 = arith.mulf %2, %2 : vector<2x8x32xf32>
    %cst_11 = arith.constant dense<0.000000e+00> : vector<2x8xf32>
    %24 = vector.multi_reduction <add>, %23, %cst_11 [2] : vector<2x8x32xf32> to vector<2x8xf32>
    %25 = vector.broadcast %5 : vector<2x1xf32> to vector<2x8xf32>
    %26 = arith.mulf %25, %24 : vector<2x8xf32>
    %cst_12 = arith.constant 1.000000e-16 : f32
    %27 = vector.broadcast %cst_12 : f32 to vector<2x8xf32>
    %28 = arith.maximumf %26, %27 : vector<2x8xf32>
    %29 = math.rsqrt %28 : vector<2x8xf32>
    %cst_13 = arith.constant 1.000000e+01 : f32
    %30 = vector.broadcast %cst_13 : f32 to vector<2x8xf32>
    %31 = arith.mulf %29, %30 : vector<2x8xf32>
    %32 = arith.mulf %22, %31 : vector<2x8xf32>
    %cst_14 = arith.constant dense<0xFF800000> : vector<2xf32>
    %33 = vector.multi_reduction <maximumf>, %32, %cst_14 [1] : vector<2x8xf32> to vector<2xf32>
    %34 = vector.shape_cast %33 : vector<2xf32> to vector<2x1xf32>
    %35 = arith.maximumf %18, %34 : vector<2x1xf32>
    %36 = arith.subf %18, %35 : vector<2x1xf32>
    %37 = math.exp %36 : vector<2x1xf32>
    %38 = vector.broadcast %35 : vector<2x1xf32> to vector<2x8xf32>
    %39 = arith.subf %32, %38 : vector<2x8xf32>
    %40 = math.exp %39 : vector<2x8xf32>
    %cst_15 = arith.constant dense<0.000000e+00> : vector<2xf32>
    %41 = vector.multi_reduction <add>, %40, %cst_15 [1] : vector<2x8xf32> to vector<2xf32>
    %42 = vector.shape_cast %41 : vector<2xf32> to vector<2x1xf32>
    %43 = arith.addf %37, %42 : vector<2x1xf32>
    %44 = math.log %43 : vector<2x1xf32>
    %45 = arith.addf %35, %44 : vector<2x1xf32>
    %46 = arith.subf %45, %18 : vector<2x1xf32>
    %cst_16 = arith.constant dense<0.000000e+00> : vector<1xf32>
    %47 = vector.multi_reduction <add>, %46, %cst_16 [0] : vector<2x1xf32> to vector<1xf32>
    %48 = vector.shape_cast %47 : vector<1xf32> to vector<1x1xf32>
    %49 = vector.shape_cast %48 : vector<1x1xf32> to vector<1x1x1xf32>
    %c0_17 = arith.constant 0 : index
    %c0_18 = arith.constant 0 : index
    %c0_19 = arith.constant 0 : index
    %50 = vector.load %arg4[%c0_17, %c0_18, %c0_19] : memref<1x1x1xf32, #tpu.memory_space<vmem>>, vector<1x1x1xf32>
    tpu.vector_store %arg4[%c0_17, %c0_18, %c0_19], %49 {strides = array<i32>} : memref<1x1x1xf32, #tpu.memory_space<vmem>>, vector<1x1x1xf32>,
    return
  }
  func.func @transform_0(%arg0: i32) -> (i32, i32) {
    %c0_i32 = arith.constant 0 : i32
    %c0_i32_0 = arith.constant 0 : i32
    return %arg0, %c0_i32 : i32, i32
  }
  func.func @transform_1(%arg0: i32) -> (i32, i32) {
    %c0_i32 = arith.constant 0 : i32
    %c0_i32_0 = arith.constant 0 : i32
    return %arg0, %c0_i32 : i32, i32
  }
  func.func @transform_2(%arg0: i32) -> (i32, i32, i32) {
    %c0_i32 = arith.constant 0 : i32
    %c0_i32_0 = arith.constant 0 : i32
    %c0_i32_1 = arith.constant 0 : i32
    return %arg0, %c0_i32, %c0_i32_0 : i32, i32, i32
  }
  func.func @transform_3(%arg0: i32) -> (i32, i32, i32) {
    %c0_i32 = arith.constant 0 : i32
    %c0_i32_0 = arith.constant 0 : i32
    %c0_i32_1 = arith.constant 0 : i32
    return %arg0, %c0_i32, %c0_i32_0 : i32, i32, i32
  }
}

</mosaic_0001>

<bundles_post_ra>
// kernel: tpu_custom_call.1
= control target key start
LH: loop header
LB: loop body
LE: loop exit
PB: predicated region body
PF: predicated region fallthrough
CT: control target
= control target key end

     0   :  { %8 = vsyncpa [#allocation3], 0  ;;  %s437_s0 = inlined_call_operand.hbm [shape: f32[2,32], index: 0, kind: input, shape index: {}]   ;;  %s438_s1 = inlined_call_operand.hbm [shape: f32[2,32], index: 1, kind: input, shape index: {}]   ;;  %s439_s2 = inlined_call_operand.hbm [shape: f32[2,8,32], index: 2, kind: input, shape index: {}]   ;;  %s440_s3 = inlined_call_operand.hbm [shape: f32[1,1,1], index: 3, kind: output, shape index: {}]  }
   0x1   :  { %9 = vsyncpa [#allocation6], 0 }
   0x2   :  { %10 = vsyncpa [#allocation4], 0  ;;  %s365_s12 = smov [#allocation5]   ;;  %s366_s14 = smov [#allocation2]  }
   0x3   :  { %s27_s13 = sshll.u32 %s365_s12, 4  ;;  %s17_s15 = sshll.u32 %s366_s14, 4  ;;  %s28_s13 = int_to_ptr.vmem [resolvable:$true] %s27_s13  ;;  %s18_s15 = int_to_ptr.vmem [resolvable:$true] %s17_s15 }
   0x4   :  { %s287_s16 = scalar_lea.vmem %s28_s13, 32  ;;  %p292_p1 = scmp.lt.s32.totalorder %s28_s13, %s28_s13 }
   0x5   :  { %p288_p0 = scmp.ne.s32.totalorder %s28_s13, %s287_s16  ;;  %p293_p2 = scmp.lt.s32.totalorder %s287_s16, %s287_s16 }
   0x7   :  { %p294_p3 = por %p293_p2, %p292_p1 }
   0x9   :  { %p295_p4 = pnand %p294_p3, %p288_p0 }
   0xb   :  { %298 = shalt.err (!%p295_p4)
}
   0xc   :  { %30 = dma.hbm_to_vmem [thread:$0]  %s438_s1, 32, %s28_s13, [#allocation6]  }
   0xd   :  { %s307_s19 = scalar_lea.vmem %s18_s15, 32  ;;  %p312_p6 = scmp.lt.s32.totalorder %s18_s15, %s18_s15 }
   0xe   :  { %p308_p5 = scmp.ne.s32.totalorder %s18_s15, %s307_s19  ;;  %p313_p7 = scmp.lt.s32.totalorder %s307_s19, %s307_s19 }
  0x10   :  { %p314_p8 = por %p313_p7, %p312_p6 }
  0x12   :  { %p315_p9 = pnand %p314_p8, %p308_p5 }
  0x14   :  { %318 = shalt.err (!%p315_p9)
}
  0x15   :  { %20 = dma.hbm_to_vmem [thread:$0]  %s437_s0, 32, %s18_s15, [#allocation3]  }
  0x16   :  { %s367_s22 = smov [#allocation7]  }
  0x17   :  { %s36_s23 = sshll.u32 %s367_s22, 4  ;;  %s37_s23 = int_to_ptr.vmem [resolvable:$true] %s36_s23 }
  0x18   :  { %s327_s24 = scalar_lea.vmem %s37_s23, 256  ;;  %p332_p11 = scmp.lt.s32.totalorder %s37_s23, %s37_s23 }
  0x19   :  { %p328_p10 = scmp.ne.s32.totalorder %s37_s23, %s327_s24  ;;  %p333_p12 = scmp.lt.s32.totalorder %s327_s24, %s327_s24 }
  0x1b   :  { %p334_p13 = por %p333_p12, %p332_p11 }
  0x1d   :  { %p335_p0 = pnand %p334_p13, %p328_p10 }
  0x1f   :  { %338 = shalt.err (!%p335_p0)
}
  0x20   :  { %s368_s1 = smov 128   ;;  %s369_s25 = smov 8  }
  0x21   :  { %42 = dma.hbm_to_vmem [thread:$0]  %s439_s2, 256, %s37_s23, [#allocation6], %s368_s1, %s368_s1, %s369_s25  }
  0x22   :  { %359 = dma.done.wait [#allocation3], 32  }
  0x23   :  { %360 = vsyncadd [#allocation3], 4294967264 }
  0x24   :  { %361 = dma.done.wait [#allocation6], 288  }
  0x25   :  { %362 = vsyncadd [#allocation6], 4294967008  ;;  %v78_v0 = vlaneseq  ;;  %v370_v1 = vmov 1966171168   ;;  %v54_v8 = vld [vmem:[#allocation7] sm:$0xff]  ;;  %vm109_vm0 = vcmask 261120  }
  0x26   :  { %v76_v2 = vunpack.c.l.s4 %v370_v1  ;;  %v55_v9 = vld [vmem:[#allocation7 + $0x8] sm:$0xff]  ;;  %v52_v10 = vld [vmem:[#allocation2] sm:$0x3]  ;;  %vm57_vm1 = vcmask 254976   ;;  %v116_v11 = vmul.f32 %v54_v8, %v54_v8  ;;  %vm136_vm2 = vcmask 1041409   ;;  %s372_s0 = smov [#allocation8]  }
  0x27   :  { %v402_v3 = vshrl.u32 %v78_v0, 7  ;;  %v127_v4 = vand.u32 127, %v78_v0  ;;  %v117_v12 = vmul.f32 %v55_v9, %v55_v9  ;;  %v56_v13 = vmul.f32 %v52_v10, %v52_v10  ;;  %v53_v42 = vld [vmem:[#allocation5] sm:$0x3]  ;;  %s247_s2 = sshll.u32 %s372_s0, 4  ;;  %s248_s2 = int_to_ptr.vmem [resolvable:$true] %s247_s2 }
  0x28   :  { %v77_v5 = vunpack.c.0.s8 %v76_v2  ;;  %v118_v15 = vsel %vm109_vm0, %v116_v11, 0.0  ;;  %v371_v36 = vmov 0   ;;  %v65_v43 = vmul.f32 %v53_v42, %v52_v10  ;;  %s339_s28 = scalar_lea.vmem %s248_s2, 16  ;;  %s343_s29 = scalar_lea.vmem %s248_s2, 32 }
  0x29   :  { %v405_v6 = vsub.s32 %v127_v4, %v402_v3  ;;  %v58_v16 = vsel %vm57_vm1, %v56_v13, 0.0  ;;  %119 = vadd.xlane.f32.xlu0 %v118_v15  ;;  %v121_v17 = vsel %vm109_vm0, %v117_v12, 0.0  ;;  %v412_v20 = vsub.s32 0, %v402_v3  ;;  %265 = vset.pattern.permute.xlu1 %v371_v36  ;;  %p340_p1 = scmp.ne.s32.totalorder %s248_s2, %s339_s28  ;;  %p344_p2 = scmp.lt.s32.totalorder %s248_s2, %s248_s2 }
  0x2a   :  { %v80_v7 = vsub.s32 %v77_v5, %v402_v3  ;;  %59 = vadd.xlane.f32.xlu1 %v58_v16  ;;  %266 = vset.pattern.permute.xlu0 %v371_v36  ;;  %v153_v37 = vsub.s32 1, %v402_v3  ;;  %v66_v44 = vsel %vm57_vm1, %v65_v43, 0.0  ;;  %v61_v51 = vmul.f32 %v53_v42, %v53_v42  ;;  %p345_p3 = scmp.lt.s32.totalorder %s343_s29, %s339_s28 }
  0x2b   :  { %vm180_vm3 = vcmask 58368   ;;  %vm231_vm4 = vcmask 1041408   ;;  %vm239_vm5 = vcmask 0  }
  0x2c   :  { %v81_v14 = vrot.slane %v52_v10, %v80_v7  ;;  %v62_v52 = vsel %vm57_vm1, %v61_v51, 0.0  ;;  %p346_p4 = por %p345_p3, %p344_p2 }
  0x2d   :  { %122 = vadd.xlane.f32.xlu0 %v121_v17 }
  0x2e   :  { %v82_v18 = vcombine.high %v81_v14, %v81_v14  ;;  %v89_v21 = vrot.slane %v81_v14, %v80_v7  ;;  %p347_p5 = pnand %p346_p4, %p340_p1 }
  0x30   :  { %v96_v19 = vrot.slane %v82_v18, %v80_v7  ;;  %v100_v23 = vrot.slane %v89_v21, %v412_v20 }
  0x32   :  { %v104_v22 = vrot.slane %v96_v19, %v412_v20  ;;  %v107_v25 = vmul.f32 %v100_v23, %v54_v8 }
  0x34   :  { %v108_v24 = vmul.f32 %v104_v22, %v55_v9  ;;  %v110_v27 = vsel %vm109_vm0, %v107_v25, 0.0 }
  0x35   :  { %111 = vadd.xlane.f32.xlu1 %v110_v27 }
  0x36   :  { %v113_v26 = vsel %vm109_vm0, %v108_v24, 0.0 }
  0x37   :  { %114 = vadd.xlane.f32.xlu0 %v113_v26 }
  0xb2   :  { %v120_v28 = vpop.xlane.xlu0 %119 }
  0xb3   :  { %v131_v30 = vrot.slane %v120_v28, %v405_v6  ;;  %v60_v32 = vpop.xlane.xlu1 %59 }
  0xb6   :  { %v123_v29 = vpop.xlane.xlu0 %122 }
  0xb7   :  { %v135_v31 = vrot.slane %v123_v29, %v405_v6 }
  0xb9   :  { %v137_v33 = vsel %vm136_vm2, %v135_v31, %v131_v30 }
  0xba   :  { %v139_v34 = vmul.f32 %v137_v33, %v60_v32 }
  0xbc   :  { %v140_v35 = vmax.f32 %v139_v34, 1e-16 }
  0xbe   :  { %267 = vrsqrt.f32 %v140_v35  ;;  %v112_v45 = vpop.xlane.xlu1 %111 }
  0xc0   :  { %v115_v46 = vpop.xlane.xlu0 %114 }
  0xcb   :  { %v268_v38 = vpop.eup %267 }
  0xcc   :  { %v142_v39 = vmul.f32 10.0, %v268_v38 }
  0xce   :  { %v154_v40 = vrot.slane %v142_v39, %v153_v37  ;;  %v147_v41 = vrot.slane %v142_v39, %v412_v20 }
  0xd0   :  { %156 = vbcast.lane.b32.xlu0 %v154_v40, 256  ;;  %149 = vbcast.lane.b32.xlu1 %v147_v41, 256 }
  0xef   :  { %67 = vadd.xlane.f32.xlu0 %v66_v44 }
 0x142   :  { %v150_v47 = vpop.permute.xlu1 %149  ;;  %v157_v49 = vpop.permute.xlu0 %156 }
 0x143   :  { %v160_v48 = vmul.f32 %v150_v47, %v112_v45  ;;  %v161_v50 = vmul.f32 %v157_v49, %v115_v46 }
 0x145   :  { %165 = vperm.xlu1 %265, %v160_v48  }
 0x149   :  { %168 = vperm.xlu1 %265, %v161_v50  }
 0x16d   :  { %63 = vadd.xlane.f32.xlu1 %v62_v52 }
 0x178   :  { %v68_v0 = vpop.xlane.xlu0 %67 }
 0x1c0   :  { %v166_v53 = vpop.permute.xlu1 %165 }
 0x1c1   :  { %v173_v55 = vrot.slane %v166_v53, %v405_v6 }
 0x1c4   :  { %v169_v54 = vpop.permute.xlu1 %168 }
 0x1c5   :  { %v177_v56 = vrot.slane %v169_v54, %v405_v6 }
 0x1c7   :  { %v178_v57 = vsel %vm136_vm2, %v177_v56, %v173_v55 }
 0x1c8   :  { %v181_v58 = vsel %vm180_vm3, %v178_v57, -inf }
 0x1c9   :  { %182 = vmax.xlane.f32.xlu0 %v181_v58 }
 0x1f6   :  { %v64_v59 = vpop.xlane.xlu1 %63 }
 0x1f7   :  { %v69_v60 = vmul.f32 %v64_v59, %v60_v32 }
 0x1f9   :  { %v70_v61 = vmax.f32 %v69_v60, 1e-16 }
 0x1fb   :  { %269 = vrsqrt.f32 %v70_v61 }
 0x208   :  { %v270_v62 = vpop.eup %269 }
 0x209   :  { %v72_v63 = vmul.f32 10.0, %v270_v62 }
 0x20b   :  { %v73_v1 = vmul.f32 %v72_v63, %v68_v0 }
 0x252   :  { %v183_v2 = vpop.xlane.xlu0 %182 }
 0x253   :  { %v184_v3 = vmax.f32 %v73_v1, %v183_v2 }
 0x255   :  { %v192_v4 = vrot.slane %v184_v3, %v412_v20  ;;  %v196_v5 = vrot.slane %v184_v3, %v153_v37  ;;  %v185_v19 = vsub.f32 %v73_v1, %v184_v3 }
 0x257   :  { %v199_v7 = vsub.f32 %v160_v48, %v192_v4  ;;  %v200_v8 = vsub.f32 %v161_v50, %v196_v5  ;;  %v186_v20 = vmul.f32 1.442695, %v185_v19 }
 0x259   :  { %v201_v9 = vmul.f32 1.442695, %v199_v7  ;;  %v203_v10 = vmul.f32 1.442695, %v200_v8 }
 0x25b   :  { %271 = vpow2.f32 %v201_v9 }
 0x25c   :  { %273 = vpow2.f32 %v203_v10 }
 0x25d   :  { %275 = vpow2.f32 %v186_v20 }
 0x268   :  { %v272_v11 = vpop.eup %271 }
 0x269   :  { %v274_v12 = vpop.eup %273  ;;  %208 = vperm.xlu0 %266, %v272_v11  }
 0x26a   :  { %211 = vperm.xlu1 %265, %v274_v12   ;;  %v276_v21 = vpop.eup %275 }
 0x2e4   :  { %v209_v13 = vpop.permute.xlu0 %208 }
 0x2e5   :  { %v212_v14 = vpop.permute.xlu1 %211  ;;  %v216_v15 = vrot.slane %v209_v13, %v405_v6 }
 0x2e6   :  { %v220_v16 = vrot.slane %v212_v14, %v405_v6 }
 0x2e8   :  { %v221_v17 = vsel %vm136_vm2, %v220_v16, %v216_v15 }
 0x2e9   :  { %v223_v18 = vsel %vm180_vm3, %v221_v17, 0.0 }
 0x2ea   :  { %224 = vadd.xlane.f32.xlu1 %v223_v18 }
 0x373   :  { %v225_v22 = vpop.xlane.xlu1 %224 }
 0x374   :  { %v226_v23 = vadd.f32 %v276_v21, %v225_v22 }
 0x376   :  { %277 = vlog2.f32 %v226_v23 }
 0x383   :  { %v278_v24 = vpop.eup %277 }
 0x384   :  { %v228_v25 = vmul.f32 0.6931472, %v278_v24 }
 0x386   :  { %v229_v26 = vadd.f32 %v228_v25, %v184_v3 }
 0x388   :  { %v230_v27 = vsub.f32 %v229_v26, %v73_v1 }
 0x38a   :  { %v232_v28 = vsel %vm231_vm4, %v230_v27, 0.0 }
 0x38b   :  { %v233_v29 = vrot.slane %v232_v28, 4 }
 0x38d   :  { %v234_v6 = vadd.f32 %v233_v29, %v232_v28 }
 0x38f   :  { %v235_v30 = vrot.slane %v234_v6, 2 }
 0x391   :  { %v236_v31 = vadd.f32 %v235_v30, %v234_v6 }
 0x393   :  { %v237_v32 = vrot.slane %v236_v31, 1 }
 0x395   :  { %v238_v33 = vadd.f32 %v237_v32, %v236_v31 }
 0x397   :  { %240 = vst.msk [vmem:[#allocation8] sm:$0x1] %vm239_vm5, %v238_v33 }
 0x398   :  { %350 = shalt.err (!%p347_p5)
}
 0x399   :  { %250 = dma.vmem_to_hbm [thread:$0]  %s248_s2, 16, %s440_s3, [#allocation4]  }
 0x39a   :  { %363 = dma.done.wait [#allocation4], 16  }
 0x39b   :  { %364 = vsyncadd [#allocation4], 4294967280 }
 0x39c   :  { %254 = vsyncpa [#allocation3], 1 }
 0x39d   :  { %255 = vsyncpa [#allocation6], 1 }
 0x39e   :  { %256 = vsyncpa [#allocation4], 1 }

</bundles_post_ra>
